<compile_context>
chip_gen: v7x
topology: tpu7x:2x2x1
jax: 0.10.0
libtpu: 0.0.40
codegen_flags: <defaults>
</compile_context>

<pallas_src>
import functools

import jax
import jax.numpy as jnp
from jax.experimental import pallas as pl
from jax.experimental.pallas import tpu as pltpu

IN_DIM = 28 * 28      # 784
HID_DIM = 28 * 4      # 112
OUT_DIM = 10
HID_PAD = 128         # hidden padded to full lane width


def _round_up(x, m):
    return ((x + m - 1) // m) * m


def _choose_tb(B, tb_max):
    b8 = _round_up(B, 8)
    if b8 <= 8:
        return 8
    # Aim for >= 2 grid steps so the "parallel" batch axis can shard across
    # the two TensorCores on v7x; cap at tb_max for VMEM budget on v5e.
    return min(tb_max, _round_up((b8 + 1) // 2, 8))


def onlyfc_kernel(x_ref, w1_ref, b1_ref, w2_ref, b2_ref, o_ref):
    # x_ref:  (TB, 784) f32        w1_ref: (784, 128) bf16   b1_ref: (1, 128) f32
    # w2_ref: (128, 10) bf16       b2_ref: (1, 10)   f32     o_ref:  (TB, 10) f32
    x = x_ref[...].astype(jnp.bfloat16)   # cast in-kernel; free under DMA slack

    # fc1 + ReLU  (bf16 MXU inputs, f32 accumulation)
    h = jnp.dot(x, w1_ref[...], preferred_element_type=jnp.float32) + b1_ref[...]
    h = jnp.maximum(h, 0.0)

    # fc2 on bf16 MXU inputs (zero-padded hidden columns hit zero rows of w2).
    logits = jnp.dot(h.astype(jnp.bfloat16), w2_ref[...],
                     preferred_element_type=jnp.float32) + b2_ref[...]

    # Numerically stable log_softmax over the 10 real classes (no padding).
    m = jnp.max(logits, axis=-1, keepdims=True)
    s = logits - m
    lse = jnp.log(jnp.sum(jnp.exp(s), axis=-1, keepdims=True))
    o_ref[...] = s - lse


def prepare_params(w1_t, b1, w2_t, b2):
    """One-time weight prep (pad hidden dim to 128, cast matmul weights to bf16).

    Weights are stored transposed relative to PyTorch ([in, out]).
    """
    w1p = jnp.pad(w1_t.astype(jnp.bfloat16), ((0, 0), (0, HID_PAD - HID_DIM)))
    b1p = jnp.pad(b1.astype(jnp.float32),
                  (0, HID_PAD - HID_DIM)).reshape(1, HID_PAD)
    w2p = jnp.pad(w2_t.astype(jnp.bfloat16),
                  ((0, HID_PAD - HID_DIM), (0, 0)))          # (128, 10)
    b2p = b2.astype(jnp.float32).reshape(1, OUT_DIM)         # (1, 10)
    return w1p, b1p, w2p, b2p


@functools.partial(jax.jit, static_argnames=("tb_max",))
def onlyfc_forward(x, w1p, b1p, w2p, b2p, *, tb_max=2048):
    """x: [B, 1, 28, 28] or [B, 784] float32; returns log-probs [B, 10] (f32)."""
    x2d = x.reshape(-1, IN_DIM).astype(jnp.float32)   # contiguous reshape: no copy
    B = x2d.shape[0]

    TB = _choose_tb(B, tb_max)
    grid = (pl.cdiv(B, TB),)

    cost = pl.CostEstimate(
        flops=2 * B * IN_DIM * HID_PAD + 2 * B * HID_PAD * OUT_DIM,
        transcendentals=B * (OUT_DIM + 1),
        bytes_accessed=(B * IN_DIM * 4             # x (f32, single read)
                        + B * OUT_DIM * 4          # output (f32, 10 lanes)
                        + IN_DIM * HID_PAD * 2     # w1 (bf16)
                        + HID_PAD * OUT_DIM * 2    # w2 (bf16)
                        + (HID_PAD + OUT_DIM) * 4  # biases
                        ),
    )

    return pl.pallas_call(
        onlyfc_kernel,
        out_shape=jax.ShapeDtypeStruct((B, OUT_DIM), jnp.float32),
        grid=grid,
        in_specs=[
            pl.BlockSpec((TB, IN_DIM), lambda i: (i, 0)),        # x: streamed
            pl.BlockSpec((IN_DIM, HID_PAD), lambda i: (0, 0)),   # w1: resident
            pl.BlockSpec((1, HID_PAD), lambda i: (0, 0)),        # b1: resident
            pl.BlockSpec((HID_PAD, OUT_DIM), lambda i: (0, 0)),  # w2: resident
            pl.BlockSpec((1, OUT_DIM), lambda i: (0, 0)),        # b2: resident
        ],
        out_specs=pl.BlockSpec((TB, OUT_DIM), lambda i: (i, 0)),
        compiler_params=pltpu.CompilerParams(
            dimension_semantics=("parallel",),
            vmem_limit_bytes=32 * 1024 * 1024),
        cost_estimate=cost,
    )(x2d, w1p, b1p, w2p, b2p)


def init_params(key):
    """Deterministic init mimicking nn.Linear default (uniform +/- 1/sqrt(fan_in))."""
    k1, k2, k3, k4 = jax.random.split(key, 4)
    bound1 = 1.0 / jnp.sqrt(IN_DIM)
    bound2 = 1.0 / jnp.sqrt(HID_DIM)
    # Stored transposed relative to PyTorch ([in, out] instead of [out, in]).
    w1_t = jax.random.uniform(k1, (IN_DIM, HID_DIM), jnp.float32, -bound1, bound1)
    b1 = jax.random.uniform(k2, (HID_DIM,), jnp.float32, -bound1, bound1)
    w2_t = jax.random.uniform(k3, (HID_DIM, OUT_DIM), jnp.float32, -bound2, bound2)
    b2 = jax.random.uniform(k4, (OUT_DIM,), jnp.float32, -bound2, bound2)
    return w1_t, b1, w2_t, b2


if __name__ == "__main__":
    key = jax.random.PRNGKey(0)
    kx, kp = jax.random.split(key)

    # Small deterministic input consistent with MNIST-style NCHW usage.
    x = jax.random.normal(kx, (2, 1, 28, 28), jnp.float32)
    w1_t, b1, w2_t, b2 = init_params(kp)
    w1p, b1p, w2p, b2p = prepare_params(w1_t, b1, w2_t, b2)

    out = onlyfc_forward(x, w1p, b1p, w2p, b2p)
    out = jax.block_until_ready(out)

    # Pure-JAX reference following the same math path as the kernel
    # (bf16 x/w1 and bf16 h/w2 MXU inputs, f32 accumulation, f32 log_softmax),
    # i.e. the PyTorch module's forward up to bf16 matmul-input rounding.
    x2d = x.reshape(-1, IN_DIM).astype(jnp.bfloat16)
    w1b = w1_t.astype(jnp.bfloat16)
    h_ref = jnp.maximum(
        jnp.dot(x2d, w1b, preferred_element_type=jnp.float32) + b1, 0.0)
    logits_ref = jnp.dot(h_ref.astype(jnp.bfloat16), w2_t.astype(jnp.bfloat16),
                         preferred_element_type=jnp.float32) + b2
    ref = jax.nn.log_softmax(logits_ref, axis=-1)

    assert out.shape == (2, 10)
    assert jnp.allclose(out, ref, atol=2e-3, rtol=2e-3), float(
        jnp.max(jnp.abs(out - ref)))

    print("KERNEL_OK")
</pallas_src>

<mosaic_0001>
module attributes {stable_mosaic.version = 11 : i64} {
  func.func @onlyfc_kernel(%arg0: i32, %arg1: memref<8x784xf32, #tpu.memory_space<vmem>>, %arg2: memref<784x128xbf16, #tpu.memory_space<vmem>>, %arg3: memref<1x128xf32, #tpu.memory_space<vmem>>, %arg4: memref<128x10xbf16, #tpu.memory_space<vmem>>, %arg5: memref<1x10xf32, #tpu.memory_space<vmem>>, %arg6: memref<8x10xf32, #tpu.memory_space<vmem>>) attributes {dimension_semantics = [#tpu.dimension_semantics<parallel>], iteration_bounds = array<i64: 1>, scalar_prefetch = 0 : i64, scratch_operands = 0 : i64, tpu.core_type = #tpu.core_type<tc>, window_params = [{transform_indices = @transform_0, window_bounds = array<i64: 8, 784>}, {pipeline_mode = #tpu.pipeline_mode<synchronous>, transform_indices = @transform_1, window_bounds = array<i64: 784, 128>}, {pipeline_mode = #tpu.pipeline_mode<synchronous>, transform_indices = @transform_2, window_bounds = array<i64: 1, 128>}, {pipeline_mode = #tpu.pipeline_mode<synchronous>, transform_indices = @transform_3, window_bounds = array<i64: 128, 10>}, {pipeline_mode = #tpu.pipeline_mode<synchronous>, transform_indices = @transform_4, window_bounds = array<i64: 1, 10>}, {transform_indices = @transform_5, window_bounds = array<i64: 8, 10>}]} {
    %c0 = arith.constant 0 : index
    %c0_0 = arith.constant 0 : index
    %0 = vector.load %arg1[%c0, %c0_0] : memref<8x784xf32, #tpu.memory_space<vmem>>, vector<8x784xf32>
    %1 = arith.truncf %0 : vector<8x784xf32> to vector<8x784xbf16>
    %c0_1 = arith.constant 0 : index
    %c0_2 = arith.constant 0 : index
    %2 = vector.load %arg2[%c0_1, %c0_2] : memref<784x128xbf16, #tpu.memory_space<vmem>>, vector<784x128xbf16>
    %cst = arith.constant dense<0.000000e+00> : vector<8x128xf32>
    %3 = tpu.matmul %1, %2, %cst {dimension_numbers = #tpu.dot_dimension_numbers<[1], [0], [0], [1], [0, 0, 1, 1], [], []>} : vector<8x784xbf16>, vector<784x128xbf16>, vector<8x128xf32> -> vector<8x128xf32>
    %c0_3 = arith.constant 0 : index
    %c0_4 = arith.constant 0 : index
    %4 = vector.load %arg3[%c0_3, %c0_4] : memref<1x128xf32, #tpu.memory_space<vmem>>, vector<1x128xf32>
    %5 = vector.broadcast %4 : vector<1x128xf32> to vector<8x128xf32>
    %6 = arith.addf %3, %5 : vector<8x128xf32>
    %cst_5 = arith.constant 0.000000e+00 : f32
    %7 = vector.broadcast %cst_5 : f32 to vector<8x128xf32>
    %8 = arith.maximumf %6, %7 : vector<8x128xf32>
    %9 = arith.truncf %8 : vector<8x128xf32> to vector<8x128xbf16>
    %c0_6 = arith.constant 0 : index
    %c0_7 = arith.constant 0 : index
    %10 = vector.load %arg4[%c0_6, %c0_7] : memref<128x10xbf16, #tpu.memory_space<vmem>>, vector<128x10xbf16>
    %cst_8 = arith.constant dense<0.000000e+00> : vector<8x10xf32>
    %11 = tpu.matmul %9, %10, %cst_8 {dimension_numbers = #tpu.dot_dimension_numbers<[1], [0], [0], [1], [0, 0, 1, 1], [], []>} : vector<8x128xbf16>, vector<128x10xbf16>, vector<8x10xf32> -> vector<8x10xf32>
    %c0_9 = arith.constant 0 : index
    %c0_10 = arith.constant 0 : index
    %12 = vector.load %arg5[%c0_9, %c0_10] : memref<1x10xf32, #tpu.memory_space<vmem>>, vector<1x10xf32>
    %13 = vector.broadcast %12 : vector<1x10xf32> to vector<8x10xf32>
    %14 = arith.addf %11, %13 : vector<8x10xf32>
    %cst_11 = arith.constant dense<0xFF800000> : vector<8xf32>
    %15 = vector.multi_reduction <maximumf>, %14, %cst_11 [1] : vector<8x10xf32> to vector<8xf32>
    %16 = vector.shape_cast %15 : vector<8xf32> to vector<8x1xf32>
    %17 = vector.broadcast %16 : vector<8x1xf32> to vector<8x10xf32>
    %18 = arith.subf %14, %17 : vector<8x10xf32>
    %19 = math.exp %18 : vector<8x10xf32>
    %cst_12 = arith.constant dense<0.000000e+00> : vector<8xf32>
    %20 = vector.multi_reduction <add>, %19, %cst_12 [1] : vector<8x10xf32> to vector<8xf32>
    %21 = vector.shape_cast %20 : vector<8xf32> to vector<8x1xf32>
    %22 = math.log %21 : vector<8x1xf32>
    %23 = vector.broadcast %22 : vector<8x1xf32> to vector<8x10xf32>
    %24 = arith.subf %18, %23 : vector<8x10xf32>
    %c0_13 = arith.constant 0 : index
    %c0_14 = arith.constant 0 : index
    %25 = vector.load %arg6[%c0_13, %c0_14] : memref<8x10xf32, #tpu.memory_space<vmem>>, vector<8x10xf32>
    tpu.vector_store %arg6[%c0_13, %c0_14], %24 {strides = array<i32>} : memref<8x10xf32, #tpu.memory_space<vmem>>, vector<8x10xf32>,
    return
  }
  func.func @transform_0(%arg0: i32) -> (i32, i32) {
    %c0_i32 = arith.constant 0 : i32
    %c0_i32_0 = arith.constant 0 : i32
    return %arg0, %c0_i32 : i32, i32
  }
  func.func @transform_1(%arg0: i32) -> (i32, i32) {
    %c0_i32 = arith.constant 0 : i32
    %c0_i32_0 = arith.constant 0 : i32
    %c0_i32_1 = arith.constant 0 : i32
    return %c0_i32, %c0_i32_0 : i32, i32
  }
  func.func @transform_2(%arg0: i32) -> (i32, i32) {
    %c0_i32 = arith.constant 0 : i32
    %c0_i32_0 = arith.constant 0 : i32
    %c0_i32_1 = arith.constant 0 : i32
    return %c0_i32, %c0_i32_0 : i32, i32
  }
  func.func @transform_3(%arg0: i32) -> (i32, i32) {
    %c0_i32 = arith.constant 0 : i32
    %c0_i32_0 = arith.constant 0 : i32
    %c0_i32_1 = arith.constant 0 : i32
    return %c0_i32, %c0_i32_0 : i32, i32
  }
  func.func @transform_4(%arg0: i32) -> (i32, i32) {
    %c0_i32 = arith.constant 0 : i32
    %c0_i32_0 = arith.constant 0 : i32
    %c0_i32_1 = arith.constant 0 : i32
    return %c0_i32, %c0_i32_0 : i32, i32
  }
  func.func @transform_5(%arg0: i32) -> (i32, i32) {
    %c0_i32 = arith.constant 0 : i32
    %c0_i32_0 = arith.constant 0 : i32
    return %arg0, %c0_i32 : i32, i32
  }
}

</mosaic_0001>

<bundles_post_ra>
// kernel: onlyfc_forward.1
= control target key start
LH: loop header
LB: loop body
LE: loop exit
PB: predicated region body
PF: predicated region fallthrough
CT: control target
= control target key end

     0   :  { %10 = vsyncpa [#allocation3], 0  ;;  %s1280_s0 = inlined_call_operand.vmem [shape: f32[2,784], index: 0, kind: input, shape index: {}]   ;;  %s1281_s1 = inlined_call_operand.hbm [shape: bf16[784,128], index: 1, kind: input, shape index: {}]   ;;  %s1282_s2 = inlined_call_operand.vmem [shape: f32[1,128], index: 2, kind: input, shape index: {}]   ;;  %s1283_s3 = inlined_call_operand.vmem [shape: bf16[128,10], index: 3, kind: input, shape index: {}]   ;;  %s1284_s4 = inlined_call_operand.vmem [shape: f32[1,10], index: 4, kind: input, shape index: {}]   ;;  %s1285_s5 = inlined_call_operand.hbm [shape: f32[2,10], index: 5, kind: output, shape index: {}]  }
   0x1   :  { %11 = vsyncpa [#allocation4], 0  ;;  %s1137_s18 = smov [#allocation2]   ;;  %s1089_s22 = scalar_lea.hbm %s1281_s1, 6272 }
   0x2   :  { %s19_s19 = sshll.u32 %s1137_s18, 4  ;;  %p1090_p0 = scmp.ne.s32.totalorder %s1281_s1, %s1089_s22  ;;  %s20_s19 = int_to_ptr.vmem [resolvable:$true] %s19_s19 }
   0x3   :  { %p1093_p1 = scmp.lt.u32.totalorder %s1089_s22, %s1281_s1 }
   0x5   :  { %p1095_p2 = pnand %p1093_p1, %p1090_p0 }
   0x7   :  { %1098 = shalt.err (!%p1095_p2)
}
   0x8   :  { %s1099_s27 = scalar_lea.vmem %s20_s19, 6272  ;;  %p1104_p4 = scmp.lt.s32.totalorder %s20_s19, %s20_s19 }
   0x9   :  { %p1100_p3 = scmp.ne.s32.totalorder %s20_s19, %s1099_s27  ;;  %p1105_p5 = scmp.lt.s32.totalorder %s1099_s27, %s1099_s27 }
   0xb   :  { %p1106_p6 = por %p1105_p5, %p1104_p4 }
   0xd   :  { %p1107_p7 = pnand %p1106_p6, %p1100_p3 }
   0xf   :  { %1110 = shalt.err (!%p1107_p7)
}
  0x10   :  { %s1138_s28 = smov 64   ;;  %s1139_s29 = smov 4  }
  0x11   :  { %25 = dma.hbm_to_vmem [thread:$0]  %s1281_s1, 6272, %s20_s19, [#allocation3], %s1138_s28, %s1138_s28, %s1139_s29  }
  0x12   :  { %1133 = dma.done.wait [#allocation3], 6272  }
  0x13   :  { %1134 = vsyncadd [#allocation3], 4294961024  ;;  %v1016_v0 = vld [vmem:[#allocation2 + $0x40] sm:$0xff]   ;;  %v1020_v4 = vld [vmem:[#allocation2 + $0x48] sm:$0xff]   ;;  %v1140_v23 = vmov 1983009808   ;;  %v59_v25 = vlaneseq }
  0x14   :  { %v1017_v1 = vld [vmem:[#allocation2] sm:$0xff]   ;;  %904 = vmatprep.subr.bf16.mxu0 %v1016_v0  ;;  %v1021_v5 = vld [vmem:[#allocation2 + $0x8] sm:$0xff]   ;;  %v1024_v8 = vld [vmem:[#allocation2 + $0x50] sm:$0xff]   ;;  %v57_v24 = vunpack.c.l.s4 %v1140_v23  ;;  %v1141_v47 = vmov 0.0   ;;  %vm1142_vm0 = vmmov 0   ;;  %vm536_vm1 = vcmask 130048  }
  0x15   :  { %v1018_v2 = vld [vmem:[#allocation2 + $0xc0] sm:$0xff]   ;;  %905 = vmatpush3.bf16.msra.mxu0 %v1017_v1  ;;  %v1022_v6 = vld [vmem:[#allocation2 + $0xc8] sm:$0xff]   ;;  %v1025_v9 = vld [vmem:[#allocation2 + $0x10] sm:$0xff]   ;;  %v60_v31 = vshrl.u32 %v59_v25, 7  ;;  %vm813_vm2 = vcmask 80896  }
  0x16   :  { %v1019_v3 = vld [vmem:[#allocation2 + $0x80] sm:$0xff]   ;;  %926 = vmatprep.subr.bf16.mxu1 %v1018_v2  ;;  %906 = vmatprep.subr.bf16.mxu0 %v1020_v4  ;;  %v1023_v7 = vld [vmem:[#allocation2 + $0x88] sm:$0xff]   ;;  %v1026_v10 = vld [vmem:[#allocation2 + $0xd0] sm:$0xff]   ;;  %v58_v30 = vunpack.c.0.s8 %v57_v24 }
  0x17   :  { %927 = vmatpush3.bf16.msra.mxu1 %v1019_v3  ;;  %v1027_v11 = vld [vmem:[#allocation2 + $0x90] sm:$0xff]   ;;  %v1028_v12 = vld [vmem:[#allocation2 + $0x58] sm:$0xff]   ;;  %v1032_v16 = vld [vmem:[#allocation2 + $0x60] sm:$0xff]  }
  0x18   :  { %928 = vmatprep.subr.bf16.mxu1 %v1022_v6  ;;  %v1029_v13 = vld [vmem:[#allocation2 + $0x18] sm:$0xff]   ;;  %v1033_v17 = vld [vmem:[#allocation2 + $0x20] sm:$0xff]   ;;  %v1036_v20 = vld [vmem:[#allocation2 + $0x68] sm:$0xff]   ;;  %v1188_v36 = vsub.s32 %v58_v30, %v60_v31 }
  0x19   :  { %907 = vmatpush3.bf16.msra.mxu0 %v1021_v5  ;;  %v1030_v14 = vld [vmem:[#allocation2 + $0xd8] sm:$0xff]   ;;  %v1034_v18 = vld [vmem:[#allocation2 + $0xe0] sm:$0xff]   ;;  %v1037_v21 = vld [vmem:[#allocation2 + $0x28] sm:$0xff]  }
  0x1a   :  { %908 = vmatprep.subr.bf16.mxu0 %v1024_v8  ;;  %v1031_v15 = vld [vmem:[#allocation2 + $0x98] sm:$0xff]   ;;  %v1035_v19 = vld [vmem:[#allocation2 + $0xa0] sm:$0xff]   ;;  %v1038_v22 = vld [vmem:[#allocation2 + $0xe8] sm:$0xff]  }
  0x1b   :  { %929 = vmatpush3.bf16.msra.mxu1 %v1023_v7  ;;  %v1039_v26 = vld [vmem:[#allocation2 + $0xa8] sm:$0xff]   ;;  %v1040_v27 = vld [vmem:[#allocation2 + $0x70] sm:$0xff]   ;;  %v1044_v33 = vld [vmem:[#allocation2 + $0x78] sm:$0xff]  }
  0x1c   :  { %930 = vmatprep.subr.bf16.mxu1 %v1026_v10  ;;  %v1041_v28 = vld [vmem:[#allocation2 + $0x30] sm:$0xff]   ;;  %v1045_v34 = vld [vmem:[#allocation2 + $0x38] sm:$0xff]   ;;  %v1052_v42 = vld [vmem:[#allocation2 + $0x140] sm:$0xff]  }
  0x1d   :  { %909 = vmatpush3.bf16.msra.mxu0 %v1025_v9  ;;  %v1042_v29 = vld [vmem:[#allocation2 + $0xf0] sm:$0xff]   ;;  %v1046_v35 = vld [vmem:[#allocation2 + $0xf8] sm:$0xff]   ;;  %v1055_v52 = vld [vmem:[#allocation2 + $0x100] sm:$0xff]  }
  0x1e   :  { %910 = vmatprep.subr.bf16.mxu0 %v1028_v12  ;;  %v1043_v32 = vld [vmem:[#allocation2 + $0xb0] sm:$0xff]   ;;  %v1049_v38 = vld [vmem:[%s1280_s0 + $0x1c] ss:$14 sps:$4 sm:$0xff]   ;;  %v1062_v63 = vld [vmem:[#allocation2 + $0x160] sm:$0xff]  }
  0x1f   :  { %931 = vmatpush3.bf16.msra.mxu1 %v1027_v11  ;;  %v1047_v37 = vld [vmem:[%s1280_s0] ss:$14 sps:$4 sm:$0xff]   ;;  %v1051_v39 = vld [vmem:[#allocation2 + $0xb8] sm:$0xff]   ;;  %v76_v41 = vrot.slane %v1049_v38, %v1188_v36  ;;  %v1053_v43 = vld [vmem:[%s1280_s0 + $0x4] ss:$14 sps:$4 sm:$0xff]  }
  0x20   :  { %932 = vmatprep.subr.bf16.mxu1 %v1030_v14  ;;  %v62_v40 = vrot.slane %v1047_v37, %v1188_v36  ;;  %v1054_v44 = vld [vmem:[%s1280_s0 + $0x20] ss:$14 sps:$4 sm:$0xff]   ;;  %v69_v48 = vrot.slane %v1053_v43, %v1188_v36  ;;  %v1060_v61 = vld [vmem:[#allocation2 + $0x158] sm:$0xff]   ;;  %v1074_v5 = vld [vmem:[%s1280_s0 + $0x24] ss:$14 sps:$4 sm:$0xff]  }
  0x21   :  { %911 = vmatpush3.bf16.msra.mxu0 %v1029_v13  ;;  %v83_v49 = vrot.slane %v1054_v44, %v1188_v36  ;;  %v1056_v55 = vld [vmem:[#allocation2 + $0x148] sm:$0xff]   ;;  %v1058_v59 = vld [vmem:[#allocation2 + $0x150] sm:$0xff]   ;;  %v1061_v62 = vld [vmem:[#allocation2 + $0x118] sm:$0xff]   ;;  %v112_v10 = vrot.slane %v1074_v5, %v1188_v36 }
  0x22   :  { %912 = vmatprep.subr.bf16.mxu0 %v1032_v16  ;;  %v85_v45 = vcombine.high %v62_v40, %v76_v41  ;;  %v84_v46 = vcombine.low %v62_v40, %v76_v41  ;;  %v1057_v58 = vld [vmem:[#allocation2 + $0x108] sm:$0xff]   ;;  %v1059_v60 = vld [vmem:[#allocation2 + $0x110] sm:$0xff]   ;;  %v1070_v0 = vld [vmem:[#allocation2 + $0x180] sm:$0xff]  }
  0x23   :  { %933 = vmatpush3.bf16.msra.mxu1 %v1031_v15  ;;  %v87_v53 = vcombine.high %v69_v48, %v83_v49  ;;  %v86_v54 = vcombine.low %v69_v48, %v83_v49  ;;  %v1063_v1 = vld [vmem:[#allocation2 + $0x120] sm:$0xff]   ;;  %v1071_v2 = vld [vmem:[%s1280_s0 + $0x8] ss:$14 sps:$4 sm:$0xff]   ;;  %v1073_v3 = vld [vmem:[%s1280_s0 + $0xc] ss:$14 sps:$4 sm:$0x33]  }
  0x24   :  { %934 = vmatprep.subr.bf16.mxu1 %v1034_v18  ;;  %v131_v50 = vpack.c.bf16 %v85_v45, %v85_v45  ;;  %v130_v51 = vpack.c.bf16 %v84_v46, %v84_v46  ;;  %v1064_v4 = vld [vmem:[#allocation2 + $0x168] sm:$0xff]   ;;  %v98_v7 = vrot.slane %v1071_v2, %v1188_v36  ;;  %v105_v8 = vrot.slane %v1073_v3, %v1188_v36  ;;  %v1066_v12 = vld [vmem:[#allocation2 + $0x170] sm:$0xff]   ;;  %v1068_v18 = vld [vmem:[#allocation2 + $0x178] sm:$0xff]  }
  0x25   :  { %913 = vmatpush3.bf16.msra.mxu0 %v1033_v17  ;;  %v133_v56 = vpack.c.bf16 %v87_v53, %v87_v53  ;;  %v132_v57 = vpack.c.bf16 %v86_v54, %v86_v54  ;;  %v1076_v6 = vld [vmem:[%s1280_s0 + $0x28] ss:$14 sps:$4 sm:$0x33]   ;;  %v1080_v25 = vld [vmem:[%s1283_s3 + $0x18] sm:$0xff]   ;;  %v844_v31 = vld [vmem:[%s1282_s2] ss:$0 sm:$0xff] }
  0x26   :  { %914 = vmatprep.subr.bf16.mxu0 %v1036_v20  ;;  %572 = vmatprep.mubr.bf16.mxu0 %v131_v50  ;;  %v1065_v9 = vld [vmem:[#allocation2 + $0x128] sm:$0xff]   ;;  %v119_v11 = vrot.slane %v1076_v6, %v1188_v36  ;;  %v121_v13 = vcombine.high %v98_v7, %v112_v10  ;;  %v1067_v17 = vld [vmem:[#allocation2 + $0x130] sm:$0xff]   ;;  %v1069_v20 = vld [vmem:[#allocation2 + $0x138] sm:$0xff]  }
  0x27   :  { %935 = vmatpush3.bf16.msra.mxu1 %v1035_v19  ;;  %612 = vmatprep.mubr.bf16.mxu1 %v133_v56  ;;  %v120_v19 = vcombine.low %v98_v7, %v112_v10  ;;  %v1078_v23 = vld [vmem:[%s1283_s3 + $0x8] sm:$0xff]   ;;  %v1079_v24 = vld [vmem:[%s1283_s3 + $0x10] sm:$0xff]   ;;  %v895_v56 = vld [vmem:[%s1284_s4] ss:$0 sm:$0xff] }
  0x28   :  { %936 = vmatprep.subr.bf16.mxu1 %v1038_v22  ;;  %v122_v14 = vcombine.low %v105_v8, %v119_v11  ;;  %v135_v15 = vpack.c.bf16 %v121_v13, %v121_v13  ;;  %v1077_v22 = vld [vmem:[%s1283_s3] sm:$0xff]  }
  0x29   :  { %915 = vmatpush3.bf16.msra.mxu0 %v1037_v21  ;;  %v134_v21 = vpack.c.bf16 %v120_v19, %v120_v19 }
  0x2a   :  { %916 = vmatprep.subr.bf16.mxu0 %v1040_v27  ;;  %v136_v16 = vpack.c.bf16 %v122_v14, %v122_v14  ;;  %v1082_v27 = vld [vmem:[%s1283_s3 + $0x28] sm:$0xff]  }
  0x2b   :  { %937 = vmatpush3.bf16.msra.mxu1 %v1039_v26  ;;  %v1081_v26 = vld [vmem:[%s1283_s3 + $0x20] sm:$0xff]  }
  0x2c   :  { %938 = vmatprep.subr.bf16.mxu1 %v1042_v29  ;;  %v1084_v29 = vld [vmem:[%s1283_s3 + $0x38] sm:$0xff]  }
  0x2d   :  { %917 = vmatpush3.bf16.msra.mxu0 %v1041_v28  ;;  %v1083_v28 = vld [vmem:[%s1283_s3 + $0x30] sm:$0xff]  }
  0x2e   :  { %918 = vmatprep.subr.bf16.mxu0 %v1044_v33 }
  0x2f   :  { %939 = vmatpush3.bf16.msra.mxu1 %v1043_v32 }
  0x30   :  { %940 = vmatprep.subr.bf16.mxu1 %v1046_v35 }
  0x31   :  { %919 = vmatpush3.bf16.msra.mxu0 %v1045_v34 }
  0x32   :  { %948 = vmatprep.subr.bf16.mxu0 %v1052_v42 }
  0x33   :  { %941 = vmatpush3.bf16.msra.mxu1 %v1051_v39 }
  0x34   :  { %981 = vmatprep.subr.bf16.mxu1 %v1141_v47  ;;  %573 = vmatmul.mubr.bf16.vlgmr.msra.gmra.mrb[0].mxu0 %v130_v51 }
  0x35   :  { %949 = vmatpush3.bf16.msra.mxu0 %v1055_v52  ;;  %652 = vmatprep.mubr.bf16.mxu0 %v135_v15 }
  0x36   :  { %950 = vmatprep.subr.bf16.mxu0 %v1056_v55  ;;  %613 = vmatmul.mubr.bf16.vlgmr.msra.gmra.mrb[0].mxu1 %v132_v57 }
  0x37   :  { %983 = vmatprep.mubr.msk.bf16.mxu1 %vm1142_vm0, %v1141_v47  ;;  %982 = vmatpush3.bf16.msra.mxu1 %v1070_v0 }
  0x38   :  { %987 = vmatprep.subr.bf16.mxu1 %v1141_v47 }
  0x39   :  { %951 = vmatpush3.bf16.msra.mxu0 %v1057_v58 }
  0x3a   :  { %952 = vmatprep.subr.bf16.mxu0 %v1058_v59 }
  0x3d   :  { %953 = vmatpush3.bf16.msra.mxu0 %v1059_v60 }
  0x3e   :  { %954 = vmatprep.subr.bf16.mxu0 %v1060_v61  ;;  %984 = vmatmul.mubr.msk.bf16.vlgmr.msra.gmra.mrb[4].mxu1 %vm536_vm1, %v136_v16 }
  0x3f   :  { %1003 = vmatprep.mubr.msk.bf16.mxu1 %vm1142_vm0, %v1141_v47  ;;  %988 = vmatpush3.bf16.msra.mxu1 %v1077_v22 }
  0x40   :  { %989 = vmatprep.subr.bf16.mxu1 %v1141_v47 }
  0x41   :  { %955 = vmatpush3.bf16.msra.mxu0 %v1061_v62 }
  0x42   :  { %956 = vmatprep.subr.bf16.mxu0 %v1062_v63 }
  0x43   :  { %990 = vmatpush3.bf16.msra.mxu1 %v1078_v23 }
  0x44   :  { %991 = vmatprep.subr.bf16.mxu1 %v1141_v47 }
  0x45   :  { %957 = vmatpush3.bf16.msra.mxu0 %v1063_v1 }
  0x46   :  { %958 = vmatprep.subr.bf16.mxu0 %v1064_v4 }
  0x47   :  { %992 = vmatpush3.bf16.msra.mxu1 %v1079_v24 }
  0x48   :  { %993 = vmatprep.subr.bf16.mxu1 %v1141_v47 }
  0x49   :  { %959 = vmatpush3.bf16.msra.mxu0 %v1065_v9 }
  0x4a   :  { %960 = vmatprep.subr.bf16.mxu0 %v1066_v12 }
  0x4b   :  { %994 = vmatpush3.bf16.msra.mxu1 %v1080_v25 }
  0x4c   :  { %995 = vmatprep.subr.bf16.mxu1 %v1141_v47 }
  0x4d   :  { %961 = vmatpush3.bf16.msra.mxu0 %v1067_v17 }
  0x4e   :  { %962 = vmatprep.subr.bf16.mxu0 %v1068_v18 }
  0x4f   :  { %996 = vmatpush3.bf16.msra.mxu1 %v1081_v26 }
  0x50   :  { %997 = vmatprep.subr.bf16.mxu1 %v1141_v47 }
  0x51   :  { %963 = vmatpush3.bf16.msra.mxu0 %v1069_v20 }
  0x53   :  { %998 = vmatpush3.bf16.msra.mxu1 %v1082_v27 }
  0x54   :  { %653 = vmatmul.mubr.bf16.vlgmr.msra.gmra.mrb[4].mxu0 %v134_v21  ;;  %999 = vmatprep.subr.bf16.mxu1 %v1141_v47 }
  0x57   :  { %1000 = vmatpush3.bf16.msra.mxu1 %v1083_v28 }
  0x58   :  { %1001 = vmatprep.subr.bf16.mxu1 %v1141_v47 }
  0x5b   :  { %1002 = vmatpush3.bf16.msra.mxu1 %v1084_v29 }
 0x107   :  { %v920_v30 = vpop.f32.mrb[0].mxu0 }
 0x108   :  { %v921_v32 = vpop.f32.mrb[1].mxu0 }
 0x109   :  { %v922_v33 = vadd.f32 %v921_v32, %v920_v30  ;;  %v923_v34 = vpop.f32.mrb[2].mxu0  ;;  %v942_v35 = vpop.f32.mrb[0].mxu1 }
 0x10a   :  { %v924_v36 = vpop.f32.mrb[3].mxu0  ;;  %v943_v38 = vpop.f32.mrb[1].mxu1 }
 0x10b   :  { %v575_v37 = vadd.f32 %v922_v33, %v844_v31  ;;  %v944_v39 = vadd.f32 %v943_v38, %v942_v35  ;;  %v945_v40 = vpop.f32.mrb[2].mxu1 }
 0x10c   :  { %v946_v41 = vpop.f32.mrb[3].mxu1 }
 0x10d   :  { %v615_v42 = vadd.f32 %v944_v39, %v575_v37 }
 0x111   :  { %v694_v43 = vpop.f32.mrb[4].mxu1 }
 0x112   :  { %v985_v44 = vpop.f32.mrb[5].mxu1 }
 0x113   :  { %v697_v45 = vpop.f32.mrb[6].mxu1 }
 0x114   :  { %v986_v46 = vpop.f32.mrb[7].mxu1 }
 0x127   :  { %v964_v47 = vpop.f32.mrb[4].mxu0 }
 0x128   :  { %v965_v48 = vpop.f32.mrb[5].mxu0 }
 0x129   :  { %v966_v49 = vadd.f32 %v965_v48, %v964_v47  ;;  %v967_v50 = vpop.f32.mrb[6].mxu0 }
 0x12a   :  { %v968_v51 = vpop.f32.mrb[7].mxu0 }
 0x12b   :  { %v655_v52 = vadd.f32 %v966_v49, %v615_v42 }
 0x12d   :  { %v695_v53 = vadd.f32 %v694_v43, %v655_v52 }
 0x12f   :  { %v700_v54 = vmax.f32 %v695_v53, 0.0 }
 0x131   :  { %v701_v55 = vpack.c.bf16 %v700_v54, %v700_v54 }
 0x133   :  { %1004 = vmatmul.mubr.bf16.vlgmr.msra.gmra.mrb[8].mxu1 %v701_v55 }
 0x206   :  { %v807_v57 = vpop.f32.mrb[8].mxu1 }
 0x207   :  { %v808_v58 = vadd.f32 %v895_v56, %v807_v57  ;;  %v1005_v59 = vpop.f32.mrb[9].mxu1 }
 0x208   :  { %v810_v60 = vpop.f32.mrb[10].mxu1 }
 0x209   :  { %v1006_v61 = vpop.f32.mrb[11].mxu1  ;;  %v814_v62 = vsel %vm813_vm2, %v808_v58, -inf }
 0x20a   :  { %815 = vmax.xlane.f32.xlu0 %v814_v62 }
 0x297   :  { %v816_v63 = vpop.xlane.xlu0 %815 }
 0x298   :  { %v817_v0 = vsub.f32 %v808_v58, %v816_v63 }
 0x29a   :  { %v818_v1 = vmul.f32 1.442695, %v817_v0 }
 0x29c   :  { %1085 = vpow2.f32 %v818_v1 }
 0x2a6   :  { %v1086_v2 = vpop.eup %1085 }
 0x2a7   :  { %v820_v3 = vsel %vm813_vm2, %v1086_v2, 0.0 }
 0x2a8   :  { %821 = vadd.xlane.f32.xlu0 %v820_v3 }
 0x335   :  { %v822_v4 = vpop.xlane.xlu0 %821 }
 0x336   :  { %1087 = vlog2.f32 %v822_v4 }
 0x340   :  { %v1088_v5 = vpop.eup %1087 }
 0x341   :  { %v824_v6 = vmul.f32 0.6931472, %v1088_v5 }
 0x343   :  { %v825_v7 = vsub.f32 %v817_v0, %v824_v6 }
 0x345   :  { %826 = vst.msk [vmem:[#allocation5] sm:$0xff] %vm813_vm2, %v825_v7 }
 0x346   :  { %831 = vsyncadd [#allocation4], 96  ;;  %s1143_s4 = smov [#allocation5]  }
 0x347   :  { %s832_s13 = sshll.u32 %s1143_s4, 4  ;;  %s833_s13 = int_to_ptr.vmem [resolvable:$true] %s832_s13 }
 0x348   :  { %s1111_s14 = scalar_lea.vmem %s833_s13, 32  ;;  %s1115_s15 = scalar_lea.vmem %s833_s13, 128 }
 0x349   :  { %p1112_p8 = scmp.ne.s32.totalorder %s833_s13, %s1111_s14  ;;  %p1116_p9 = scmp.lt.s32.totalorder %s833_s13, %s833_s13 }
 0x34a   :  { %p1117_p10 = scmp.lt.s32.totalorder %s1115_s15, %s1111_s14 }
 0x34c   :  { %p1118_p11 = por %p1117_p10, %p1116_p9 }
 0x34e   :  { %p1119_p12 = pnand %p1118_p11, %p1112_p8 }
 0x350   :  { %1122 = shalt.err (!%p1119_p12)
}
 0x351   :  { %s1123_s18 = scalar_lea.hbm %s1285_s5, 32 }
 0x352   :  { %p1124_p13 = scmp.ne.s32.totalorder %s1285_s5, %s1123_s18  ;;  %p1127_p0 = scmp.lt.u32.totalorder %s1123_s18, %s1285_s5 }
 0x354   :  { %p1129_p1 = pnand %p1127_p0, %p1124_p13 }
 0x356   :  { %1132 = shalt.err (!%p1129_p1)
}
 0x357   :  { %s1144_s22 = smov 32   ;;  %s1145_s23 = smov 2  }
 0x358   :  { %838 = dma.vmem_to_hbm [thread:$0]  %s833_s13, 32, %s1285_s5, [#allocation4], %s1144_s22, %s1144_s22, %s1145_s23  }
 0x359   :  { %1135 = dma.done.wait [#allocation4], 128  }
 0x35a   :  { %1136 = vsyncadd [#allocation4], 4294967168 }
 0x35b   :  { %842 = vsyncpa [#allocation3], 1 }
 0x35c   :  { %843 = vsyncpa [#allocation4], 1 }

</bundles_post_ra>
